<compile_context>
chip_gen: v7x
topology: tpu7x:2x2x1
jax: 0.10.0
libtpu: 0.0.40
codegen_flags: <defaults>
</compile_context>

<pallas_src>
import jax
import jax.numpy as jnp
from jax.experimental import pallas as pl
from jax.experimental.pallas import tpu as pltpu

EPSILON = 1e-6
MAP_SIGMA = 1.5  # nn.Parameter(torch.tensor([1.5])) -> deterministic constant


def _vmem_capacity_bytes() -> int:
    try:
        return int(pltpu.get_tpu_info().vmem_capacity_bytes)
    except Exception:
        return 64 << 20  # unknown chip -> assume the smallest (v7x: 64 MiB)


_VMEM_CAP = _vmem_capacity_bytes()
# Scoped-VMEM budget: leave >= 25% of physical VMEM for Mosaic internal scratch
# and never request more than 64 MiB (v5e/v6e have 128 MiB physical -> 64 MiB,
# v7x has 64 MiB physical -> 48 MiB).
_VMEM_BUDGET = int(min(64 << 20, (_VMEM_CAP * 3) // 4))
_MIN_STEP_BYTES = 1 << 20   # keep each grid step moving >= ~1 MiB of input
_TARGET_STEPS = 8           # >= 4 steps per v7x TensorCore, even total


def _round_up(x: int, m: int) -> int:
    return -(-x // m) * m


def _row_reduce_vpu_kernel(m_ref, g_ref, out_ref):
    """Exact f32 path (VPU multiplies + XLU row sums).

    m_ref : (TM, HW)  block of flattened feature maps (one row per (n, c))
    g_ref : (2, HW)   row 0 = flattened grid_x (k // W), row 1 = grid_y (k % W)
    out_ref: (TM, 3)  f32 [sum(m*gx), sum(m*gy), sum(m)] per row
    """
    m = m_ref[...].astype(jnp.float32)   # explicit f32 accumulation
    gx = g_ref[0:1, :]                   # (1, HW), sublane-broadcast over the block
    gy = g_ref[1:2, :]
    # Write the three columns directly (no lane-axis concatenate).
    out_ref[:, 0:1] = jnp.sum(m * gx, axis=-1, keepdims=True)
    out_ref[:, 1:2] = jnp.sum(m * gy, axis=-1, keepdims=True)
    out_ref[:, 2:3] = jnp.sum(m, axis=-1, keepdims=True)


def _row_reduce_mxu_kernel(m_ref, stats_ref, out_ref):
    """bf16 path: one MXU matmul against a stat matrix, f32 accumulation.

    m_ref    : (TM, HW)  bf16 block
    stats_ref: (HW, 128) bf16, columns [grid_x, grid_y, 1, 0, ..., 0]
    out_ref  : (TM, 3)   f32 [sum(m*gx), sum(m*gy), sum(m)] per row
    """
    acc = jnp.dot(m_ref[...], stats_ref[...], preferred_element_type=jnp.float32)
    out_ref[...] = acc[:, :3]


def _choose_tm(rows: int, hw: int, in_itemsize: int,
               work_bytes_per_row: int, fixed_bytes: int) -> int:
    """Rows of the flattened (N*C, H*W) array processed per grid step.

    Largest block fitting the VMEM budget, then shrunk (only if each step still
    moves >= _MIN_STEP_BYTES of input) to expose >= _TARGET_STEPS steps with an
    even total so both v7x TensorCores pipeline several blocks each.
    """
    sub = max(8, 32 // max(1, in_itemsize))       # sublane tile: f32->8, bf16->16, int8->32
    per_row = 2 * hw * in_itemsize + work_bytes_per_row + 32   # dbl-buffered input + work + out
    avail = max(sub * per_row, _VMEM_BUDGET - fixed_bytes - (4 << 20))
    tm = max(sub, min(_round_up(rows, sub), (avail // per_row) // sub * sub))

    min_rows_per_step = max(sub, _round_up(-(-_MIN_STEP_BYTES // (hw * in_itemsize)), sub))
    tm_for_steps = max(sub, _round_up(-(-rows // _TARGET_STEPS), sub))
    if tm_for_steps >= min_rows_per_step:
        tm = min(tm, tm_for_steps)

    # Best-effort: make the step count even (balanced megacore split).
    steps = -(-rows // tm)
    if steps > 1 and steps % 2 == 1:
        tm_even = max(sub, _round_up(-(-rows // (steps + 1)), sub))
        if tm_even >= min_rows_per_step and (-(-rows // tm_even)) % 2 == 0:
            tm = tm_even
    return tm


@jax.jit
def feature_maps_to_key_points(feature_maps: jax.Array) -> jax.Array:
    """(N, C, H, W) non-negative feature maps -> (N, C, 4) keypoints [x, y, mu, sigma]."""
    N, C, H, W = feature_maps.shape
    HW = H * W
    rows = N * C
    # TODO(synk): PyTorch's `assert torch.min(feature_maps) >= 0` is a host-side
    # runtime check with no in-kernel equivalent; it is not enforced here.
    # TODO(synk): maps so large that even an 8-row block overflows VMEM would
    # need a second (reduction) grid axis over H*W; ULOSD heatmaps are far smaller.

    # Pixel grids (linspace handles H == 1 / W == 1 without div-by-zero).
    grid_x = jnp.linspace(-1.0, 1.0, H, dtype=jnp.float32)   # torch axis=2 grid
    grid_y = jnp.linspace(1.0, -1.0, W, dtype=jnp.float32)   # torch axis=3 grid
    gx_flat = jnp.repeat(grid_x, W)                          # flat index k -> grid_x[k // W]
    gy_flat = jnp.tile(grid_y, H)                            # flat index k -> grid_y[k %  W]

    # Lane-dense flattening: each (n, c) map becomes one length-H*W row (free reshape).
    fm2d = feature_maps.reshape(rows, HW)
    in_itemsize = feature_maps.dtype.itemsize

    # bf16 -> MXU stat-matrix path (no f32 cast copy / elementwise temporaries;
    # v5e has no bf16 VPU).  f32 stays on the exact VPU path.
    use_mxu = (feature_maps.dtype == jnp.bfloat16) and (HW * 128 * in_itemsize <= (4 << 20))

    if use_mxu:
        stats = jnp.zeros((HW, 128), jnp.float32)
        stats = stats.at[:, 0].set(gx_flat).at[:, 1].set(gy_flat).at[:, 2].set(1.0)
        stats = stats.astype(feature_maps.dtype)             # bf16 grid (~1e-3 rel. rounding)
        kernel = _row_reduce_mxu_kernel
        const_arg = stats
        const_spec = pl.BlockSpec((HW, 128), lambda i: (0, 0))   # constant block -> fetched once
        work_bytes_per_row = 2 * 128 * 4                     # (TM, 128) f32 accumulator
        fixed_bytes = 2 * HW * 128 * in_itemsize             # double-buffered stat matrix
    else:
        g = jnp.stack([gx_flat, gy_flat], axis=0)            # single (2, HW) f32 constant
        kernel = _row_reduce_vpu_kernel
        const_arg = g
        const_spec = pl.BlockSpec((2, HW), lambda i: (0, 0))
        work_bytes_per_row = 3 * HW * 4                      # f32 cast copy + m*gx + m*gy
        fixed_bytes = 2 * 2 * HW * 4                         # double-buffered grid constant

    tm = _choose_tm(rows, HW, in_itemsize, work_bytes_per_row, fixed_bytes)
    est_need = (2 * tm * HW * in_itemsize + tm * work_bytes_per_row
                + fixed_bytes + 2 * tm * 3 * 4 + (4 << 20))
    vmem_limit = int(min((_VMEM_CAP * 7) // 8, max(_VMEM_BUDGET, est_need)))

    # NOTE (tail-block invariant): grid = cdiv(rows, tm) with NO input padding.
    # When tm does not divide rows, the last input block contains unspecified
    # rows; this is safe only because every reduction is strictly per-row and
    # the corresponding out-of-bounds output rows are discarded by Pallas.
    red = pl.pallas_call(
        kernel,
        out_shape=jax.ShapeDtypeStruct((rows, 3), jnp.float32),
        grid=(pl.cdiv(rows, tm),),
        in_specs=[
            pl.BlockSpec((tm, HW), lambda i: (i, 0)),
            const_spec,
        ],
        out_specs=pl.BlockSpec((tm, 3), lambda i: (i, 0)),
        compiler_params=pltpu.CompilerParams(
            dimension_semantics=("parallel",),
            vmem_limit_bytes=vmem_limit,
        ),
    )(fm2d, const_arg)

    sx = red[:, 0].reshape(N, C)
    sy = red[:, 1].reshape(N, C)
    total = red[:, 2].reshape(N, C)

    # EPSILON folded analytically (mathematically identical to the PyTorch path):
    #   x numerator = sum_hw(m*gx) + eps*W*sum(grid_x)
    #   y numerator = sum_hw(m*gy) + eps*H*sum(grid_y)
    #   denominator = sum_hw(m)    + eps*H*W             (same for x and y)
    denom = total + EPSILON * HW
    x = (sx + EPSILON * W * jnp.sum(grid_x)) / denom
    y = (sy + EPSILON * H * jnp.sum(grid_y)) / denom

    scales = total / HW
    # Per-sample max over channels (torch.max(map_scales, dim=1, keepdim=True)[0]).
    scales = scales / (EPSILON + jnp.max(scales, axis=1, keepdims=True))

    sigma = jnp.full((N, C), MAP_SIGMA, dtype=jnp.float32)
    return jnp.stack([x, y, scales, sigma], axis=2).astype(feature_maps.dtype)


def _reference(fm: jax.Array) -> jax.Array:
    """Pure-JAX transcription of the PyTorch forward, for verification."""
    fm = fm.astype(jnp.float32)
    N, C, H, W = fm.shape
    gh = jnp.linspace(-1.0, 1.0, H)
    wx = jnp.sum(fm + EPSILON, axis=3)                       # (N, C, H)
    wx = wx / jnp.sum(wx, axis=2, keepdims=True)
    x = jnp.sum(wx * gh[None, None, :], axis=2)              # (N, C)
    gw = jnp.linspace(1.0, -1.0, W)
    wy = jnp.sum(fm + EPSILON, axis=2)                       # (N, C, W)
    wy = wy / jnp.sum(wy, axis=2, keepdims=True)
    y = jnp.sum(wy * gw[None, None, :], axis=2)              # (N, C)
    scales = jnp.mean(fm, axis=(2, 3))                       # (N, C)
    scales = scales / (EPSILON + jnp.max(scales, axis=1, keepdims=True))
    sigma = jnp.full((N, C), MAP_SIGMA, dtype=jnp.float32)
    return jnp.stack([x, y, scales, sigma], axis=2)          # (N, C, 4)


if __name__ == "__main__":
    key = jax.random.PRNGKey(0)
    N, C, H, W = 2, 4, 16, 16
    # Feature maps must be non-negative (softplus-like heatmaps in ULOSD).
    feature_maps = jax.random.uniform(key, (N, C, H, W), dtype=jnp.float32)

    out = jax.block_until_ready(feature_maps_to_key_points(feature_maps))
    ref = _reference(feature_maps)
    assert out.shape == (N, C, 4), out.shape
    assert jnp.allclose(out, ref, atol=1e-5, rtol=1e-5), (
        f"max abs err {jnp.max(jnp.abs(out - ref))}")

    # Exercise the un-padded tail-block path (rows = 21, block rows = multiple of 8).
    fm_tail = jax.random.uniform(jax.random.PRNGKey(1), (3, 7, 12, 10), dtype=jnp.float32)
    out_tail = jax.block_until_ready(feature_maps_to_key_points(fm_tail))
    ref_tail = _reference(fm_tail)
    assert out_tail.shape == (3, 7, 4), out_tail.shape
    assert jnp.allclose(out_tail, ref_tail, atol=1e-5, rtol=1e-5), (
        f"max abs err {jnp.max(jnp.abs(out_tail - ref_tail))}")

    # Exercise the bf16 / MXU stat-matrix path (loose tolerance: bf16 grid + output).
    fm_bf16 = feature_maps.astype(jnp.bfloat16)
    out_bf = jax.block_until_ready(feature_maps_to_key_points(fm_bf16)).astype(jnp.float32)
    ref_bf = _reference(fm_bf16).astype(jnp.float32)
    assert out_bf.shape == (N, C, 4), out_bf.shape
    assert jnp.allclose(out_bf, ref_bf, atol=3e-2, rtol=3e-2), (
        f"max abs err {jnp.max(jnp.abs(out_bf - ref_bf))}")

    print("KERNEL_OK")
</pallas_src>

<mosaic_0001>
module attributes {stable_mosaic.version = 11 : i64} {
  func.func @_row_reduce_vpu_kernel(%arg0: i32, %arg1: memref<8x256xf32, #tpu.memory_space<vmem>>, %arg2: memref<2x256xf32, #tpu.memory_space<vmem>>, %arg3: memref<8x3xf32, #tpu.memory_space<vmem>>) attributes {dimension_semantics = [#tpu.dimension_semantics<parallel>], iteration_bounds = array<i64: 1>, scalar_prefetch = 0 : i64, scratch_operands = 0 : i64, tpu.core_type = #tpu.core_type<tc>, window_params = [{transform_indices = @transform_0, window_bounds = array<i64: 8, 256>}, {pipeline_mode = #tpu.pipeline_mode<synchronous>, transform_indices = @transform_1, window_bounds = array<i64: 2, 256>}, {transform_indices = @transform_2, window_bounds = array<i64: 8, 3>}]} {
    %c0 = arith.constant 0 : index
    %c0_0 = arith.constant 0 : index
    %0 = vector.load %arg1[%c0, %c0_0] : memref<8x256xf32, #tpu.memory_space<vmem>>, vector<8x256xf32>
    %c0_1 = arith.constant 0 : index
    %c0_2 = arith.constant 0 : index
    %1 = vector.load %arg2[%c0_1, %c0_2] : memref<2x256xf32, #tpu.memory_space<vmem>>, vector<1x256xf32>
    %c1 = arith.constant 1 : index
    %c0_3 = arith.constant 0 : index
    %2 = vector.load %arg2[%c1, %c0_3] : memref<2x256xf32, #tpu.memory_space<vmem>>, vector<1x256xf32>
    %3 = vector.broadcast %1 : vector<1x256xf32> to vector<8x256xf32>
    %4 = arith.mulf %0, %3 : vector<8x256xf32>
    %cst = arith.constant dense<0.000000e+00> : vector<8xf32>
    %5 = vector.multi_reduction <add>, %4, %cst [1] : vector<8x256xf32> to vector<8xf32>
    %6 = vector.shape_cast %5 : vector<8xf32> to vector<8x1xf32>
    %c0_4 = arith.constant 0 : index
    %c0_5 = arith.constant 0 : index
    %7 = vector.load %arg3[%c0_4, %c0_5] : memref<8x3xf32, #tpu.memory_space<vmem>>, vector<8x1xf32>
    tpu.vector_store %arg3[%c0_4, %c0_5], %6 {strides = array<i32>} : memref<8x3xf32, #tpu.memory_space<vmem>>, vector<8x1xf32>,
    %8 = vector.broadcast %2 : vector<1x256xf32> to vector<8x256xf32>
    %9 = arith.mulf %0, %8 : vector<8x256xf32>
    %cst_6 = arith.constant dense<0.000000e+00> : vector<8xf32>
    %10 = vector.multi_reduction <add>, %9, %cst_6 [1] : vector<8x256xf32> to vector<8xf32>
    %11 = vector.shape_cast %10 : vector<8xf32> to vector<8x1xf32>
    %c0_7 = arith.constant 0 : index
    %c1_8 = arith.constant 1 : index
    %12 = vector.load %arg3[%c0_7, %c1_8] : memref<8x3xf32, #tpu.memory_space<vmem>>, vector<8x1xf32>
    tpu.vector_store %arg3[%c0_7, %c1_8], %11 {strides = array<i32>} : memref<8x3xf32, #tpu.memory_space<vmem>>, vector<8x1xf32>,
    %cst_9 = arith.constant dense<0.000000e+00> : vector<8xf32>
    %13 = vector.multi_reduction <add>, %0, %cst_9 [1] : vector<8x256xf32> to vector<8xf32>
    %14 = vector.shape_cast %13 : vector<8xf32> to vector<8x1xf32>
    %c0_10 = arith.constant 0 : index
    %c2 = arith.constant 2 : index
    %15 = vector.load %arg3[%c0_10, %c2] : memref<8x3xf32, #tpu.memory_space<vmem>>, vector<8x1xf32>
    tpu.vector_store %arg3[%c0_10, %c2], %14 {strides = array<i32>} : memref<8x3xf32, #tpu.memory_space<vmem>>, vector<8x1xf32>,
    return
  }
  func.func @transform_0(%arg0: i32) -> (i32, i32) {
    %c0_i32 = arith.constant 0 : i32
    %c0_i32_0 = arith.constant 0 : i32
    return %arg0, %c0_i32 : i32, i32
  }
  func.func @transform_1(%arg0: i32) -> (i32, i32) {
    %c0_i32 = arith.constant 0 : i32
    %c0_i32_0 = arith.constant 0 : i32
    %c0_i32_1 = arith.constant 0 : i32
    return %c0_i32, %c0_i32_0 : i32, i32
  }
  func.func @transform_2(%arg0: i32) -> (i32, i32) {
    %c0_i32 = arith.constant 0 : i32
    %c0_i32_0 = arith.constant 0 : i32
    return %arg0, %c0_i32 : i32, i32
  }
}

</mosaic_0001>

<bundles_post_ra>
// kernel: tile.8
= control target key start
LH: loop header
LB: loop body
LE: loop exit
PB: predicated region body
PF: predicated region fallthrough
CT: control target
= control target key end

     0   :  { %s28_s0 = inlined_call_operand.vmem [shape: f32[16], index: 0, kind: input, shape index: {}]   ;;  %s29_s1 = inlined_call_operand.vmem [shape: f32[16,16], index: 1, kind: output, shape index: {}]  }
   0x1   :  { %v4_v0 = vld [vmem:[%s28_s0] ss:$0 sm:$0xff] }
   0x2   :  { %5 = vst [vmem:[%s29_s1] sm:$0xff] %v4_v0  ;;  %8 = vst [vmem:[%s29_s1 + $0x8] sm:$0xff] %v4_v0 }

// kernel: feature_maps_to_key_points.1
= control target key start
LH: loop header
LB: loop body
LE: loop exit
PB: predicated region body
PF: predicated region fallthrough
CT: control target
= control target key end

     0   :  { %v17_v0 = vlaneseq  ;;  %vm32_vm0 = vcmask 7168   ;;  %vm50_vm1 = vcmask 15368   ;;  %vm55_vm2 = vcmask 23568   ;;  %s98_s0 = inlined_call_operand.vmem [shape: f32[8,256], index: 0, kind: input, shape index: {}]   ;;  %s99_s1 = inlined_call_operand.vmem [shape: f32[2,256], index: 1, kind: input, shape index: {}]   ;;  %s100_s2 = inlined_call_operand.vmem [shape: f32[8,3], index: 2, kind: output, shape index: {}]  }
   0x1   :  { %v11_v1 = vld [vmem:[%s98_s0] sm:$0xff]  ;;  %v12_v2 = vld [vmem:[%s98_s0 + $0x8] sm:$0xff] }
   0x2   :  { %v18_v3 = vshrl.u32 %v17_v0, 7  ;;  %v52_v4 = vadd.f32 %v12_v2, %v11_v1  ;;  %v13_v5 = vld [vmem:[%s99_s1] ss:$2 sm:$0x3] }
   0x3   :  { %v61_v6 = vld [vmem:[%s99_s1 + $0x1] ss:$2 sm:$0x3] }
   0x4   :  { %v19_v7 = vsub.s32 0, %v18_v3  ;;  %v23_v8 = vsub.s32 1, %v18_v3  ;;  %53 = vadd.xlane.f32.xlu1 %v52_v4 }
   0x6   :  { %v20_v9 = vrot.slane %v13_v5, %v19_v7  ;;  %v24_v10 = vrot.slane %v13_v5, %v23_v8  ;;  %v38_v11 = vrot.slane %v61_v6, %v19_v7  ;;  %v42_v12 = vrot.slane %v61_v6, %v23_v8 }
   0x8   :  { %v27_v13 = vmul.f32 %v20_v9, %v11_v1  ;;  %v28_v14 = vmul.f32 %v24_v10, %v12_v2  ;;  %v45_v15 = vmul.f32 %v38_v11, %v11_v1  ;;  %v46_v16 = vmul.f32 %v42_v12, %v12_v2 }
   0xa   :  { %v29_v17 = vadd.f32 %v28_v14, %v27_v13  ;;  %v47_v18 = vadd.f32 %v46_v16, %v45_v15 }
   0xc   :  { %30 = vadd.xlane.f32.xlu0 %v29_v17 }
  0x10   :  { %48 = vadd.xlane.f32.xlu0 %v47_v18 }
  0x91   :  { %v54_v20 = vpop.xlane.xlu1 %53 }
  0x99   :  { %v31_v19 = vpop.xlane.xlu0 %30 }
  0x9a   :  { %33 = vst.msk [vmem:[%s100_s2] sm:$0xff] %vm32_vm0, %v31_v19 }
  0x9d   :  { %v49_v21 = vpop.xlane.xlu0 %48 }
  0x9e   :  { %51 = vst.msk [vmem:[%s100_s2] sm:$0xff] %vm50_vm1, %v49_v21 }
  0x9f   :  { %56 = vst.msk [vmem:[%s100_s2] sm:$0xff] %vm55_vm2, %v54_v20 }

</bundles_post_ra>
